<compile_context>
chip_gen: v5e
topology: v5e:2x2
jax: 0.10.0
libtpu: 0.0.40
codegen_flags: <defaults>
</compile_context>

<pallas_src>
import functools
import math

import jax
import jax.numpy as jnp
from jax import lax
from jax.experimental import pallas as pl
from jax.experimental.pallas import tpu as pltpu


def _round_up(x: int, m: int) -> int:
    return ((x + m - 1) // m) * m


def _vmem_capacity_bytes() -> int:
    """Per-core VMEM capacity; conservative fallback if the query fails."""
    try:
        cap = int(pltpu.get_tpu_info().vmem_capacity_bytes)
    except Exception:  # query unavailable -> assume the smallest generation (v7x)
        cap = 64 * 1024 * 1024
    return max(cap, 64 * 1024 * 1024)


def _embed_onehot_kernel(ids_ref, table_ref, out_ref, *, scale, vocab):
    """Small-vocab path: gather == one-hot matmul on the MXU.

    ids_ref   : VMEM (T, 1) int32   -- token ids for this tile
    table_ref : VMEM (V, E)         -- full embedding table (resident)
    out_ref   : VMEM (T, E)         -- dense output tile
    """
    tbl = table_ref[...]                                   # (V, E)
    ids = ids_ref[...]                                     # (T, 1)
    t = out_ref.shape[0]
    onehot = (lax.broadcasted_iota(jnp.int32, (t, vocab), 1) == ids).astype(tbl.dtype)
    gathered = jnp.dot(onehot, tbl, preferred_element_type=jnp.float32)  # (T, E)
    out_ref[...] = (gathered * scale).astype(out_ref.dtype)


def _embed_take_kernel(ids_ref, table_ref, out_ref, *, scale):
    """Larger-vocab (but VMEM-resident) path: vectorized row gather.

    ids_ref   : VMEM (1, 1, T) int32
    table_ref : VMEM (V, E)
    out_ref   : VMEM (T, E)
    """
    ids = ids_ref[0, 0, :]                                 # (T,)
    gathered = jnp.take(table_ref[...], ids, axis=0)       # (T, E)
    out_ref[...] = (gathered * scale).astype(out_ref.dtype)


def token_embedding(tokens: jax.Array, emb_table: jax.Array,
                    *, max_tile: int = 1024,
                    onehot_max_vocab: int = 1024) -> jax.Array:
    """Equivalent of TokenEmbedding.forward: embedding(tokens.long()) * sqrt(E)."""
    B, S = tokens.shape
    V, E = emb_table.shape
    N = B * S
    itemsize = jnp.dtype(emb_table.dtype).itemsize
    table_bytes = V * E * itemsize

    capacity = _vmem_capacity_bytes()
    # Per-TensorCore budget: ~48 MiB usable on v7x (64 MiB/core), capped at
    # ~100 MiB on the 128 MiB v5e/v6e parts.
    vmem_budget = min(capacity - (16 << 20), 100 << 20)

    # Conservatively assume the pipeline may double-buffer the constant-index
    # table block when checking residency.
    resident_bytes = 2 * table_bytes
    # TODO(synk): for tables exceeding the per-core VMEM budget, add an HBM
    # (memory_space=pl.ANY) DMA row-gather fallback with a (2, T, E) double buffer.
    assert resident_bytes + 2 * 8 * E * itemsize <= vmem_budget, (
        "embedding table too large for the VMEM-resident path")

    use_onehot = V <= onehot_max_vocab

    # Pick the biggest sublane-dense token tile (multiple of 8) that fits the
    # budget next to the resident table (+ the one-hot intermediate if used).
    T = max(8, (max_tile // 8) * 8)
    def _tile_bytes(t):
        extra = t * V * itemsize if use_onehot else 0
        return resident_bytes + 2 * t * E * itemsize + extra
    while T > 8 and _tile_bytes(T) > vmem_budget:
        T = max(8, ((T // 2) // 8) * 8)

    # Avoid output padding (and the wrapper slice copy) whenever N % 8 == 0 by
    # choosing T as the largest multiple-of-8 divisor of N that fits.
    if N % 8 == 0:
        cand = min(T, N)
        cand = (cand // 8) * 8
        while cand > 8 and N % cand != 0:
            cand -= 8
        T = cand
        N_pad = N
    else:
        T = min(T, _round_up(N, 8))
        N_pad = _round_up(N, T)
    num_tiles = N_pad // T

    # Clamp ids to [0, V-1] (matches jnp.take's clipping; PyTorch would raise
    # on out-of-range ids -- documented divergence for untrusted inputs).
    ids = jnp.clip(tokens.reshape(N).astype(jnp.int32), 0, V - 1)
    if N_pad != N:
        ids = jnp.pad(ids, (0, N_pad - N))  # pad with id 0 (valid), sliced off below

    scale = float(math.sqrt(E))

    if use_onehot:
        # (T, 1) blocks: sublane-major ids, lane-broadcast against the iota.
        ids_arr = ids.reshape(N_pad, 1)
        ids_spec = pl.BlockSpec((T, 1), lambda i: (i, 0))
        kernel = functools.partial(_embed_onehot_kernel, scale=scale, vocab=V)
        onehot_bytes = 2 * T * V * itemsize
        ids_vmem = 2 * T * 128 * 4
    else:
        # (1, 1, T) blocks: lane-major id vector for the vectorized gather.
        ids_arr = ids.reshape(num_tiles, 1, T)
        ids_spec = pl.BlockSpec((1, 1, T), lambda i: (i, 0, 0))
        kernel = functools.partial(_embed_take_kernel, scale=scale)
        onehot_bytes = 0
        ids_vmem = 2 * _round_up(T, 128) * 4 * 8

    # Always set the scoped VMEM limit explicitly (v5e defaults to 16 MiB) and
    # never request more than the physical per-core capacity (v7x = 64 MiB).
    needed = (resident_bytes + 4 * T * E * itemsize + onehot_bytes + ids_vmem
              + (8 << 20))
    vmem_limit = int(min(max(needed, 16 << 20), capacity - (8 << 20)))

    out_flat = pl.pallas_call(
        kernel,
        out_shape=jax.ShapeDtypeStruct((N_pad, E), emb_table.dtype),
        grid=(num_tiles,),
        in_specs=[
            ids_spec,
            # Full table, constant block index -> kept resident in VMEM.
            pl.BlockSpec((V, E), lambda i: (0, 0)),
        ],
        out_specs=pl.BlockSpec((T, E), lambda i: (i, 0)),
        compiler_params=pltpu.CompilerParams(
            dimension_semantics=("parallel",),
            vmem_limit_bytes=vmem_limit,
        ),
    )(ids_arr, emb_table)

    out = out_flat if N_pad == N else out_flat[:N]
    return out.reshape(B, S, E)


if __name__ == "__main__":
    VOCAB = 32
    EMB = 128       # multiple of 128 for lane-dense rows
    B, S = 2, 8

    key = jax.random.PRNGKey(0)
    k_tok, k_emb = jax.random.split(key)

    tokens = jax.random.randint(k_tok, (B, S), 0, VOCAB, dtype=jnp.int32)
    emb_table = jax.random.normal(k_emb, (VOCAB, EMB), dtype=jnp.float32)

    out = token_embedding(tokens, emb_table)
    out = jax.block_until_ready(out)

    # Pure-JAX reference for sanity.
    ref = jnp.take(emb_table, tokens, axis=0) * math.sqrt(EMB)
    assert out.shape == (B, S, EMB)
    assert jnp.allclose(out, ref, atol=1e-4, rtol=1e-4)

    print("KERNEL_OK")
</pallas_src>

<mosaic_0001>
module attributes {stable_mosaic.version = 11 : i64} {
  func.func @_embed_onehot_kernel(%arg0: i32, %arg1: memref<16x1xi32, #tpu.memory_space<vmem>>, %arg2: memref<32x128xf32, #tpu.memory_space<vmem>>, %arg3: memref<16x128xf32, #tpu.memory_space<vmem>>) attributes {dimension_semantics = [#tpu.dimension_semantics<parallel>], iteration_bounds = array<i64: 1>, scalar_prefetch = 0 : i64, scratch_operands = 0 : i64, tpu.core_type = #tpu.core_type<tc>, window_params = [{transform_indices = @transform_0, window_bounds = array<i64: 16, 1>}, {pipeline_mode = #tpu.pipeline_mode<synchronous>, transform_indices = @transform_1, window_bounds = array<i64: 32, 128>}, {transform_indices = @transform_2, window_bounds = array<i64: 16, 128>}]} {
    %c0 = arith.constant 0 : index
    %c0_0 = arith.constant 0 : index
    %0 = vector.load %arg2[%c0, %c0_0] : memref<32x128xf32, #tpu.memory_space<vmem>>, vector<32x128xf32>
    %c0_1 = arith.constant 0 : index
    %c0_2 = arith.constant 0 : index
    %1 = vector.load %arg1[%c0_1, %c0_2] : memref<16x1xi32, #tpu.memory_space<vmem>>, vector<16x1xi32>
    %2 = tpu.iota {dimensions = array<i32: 1>} : vector<16x32xi32>
    %3 = vector.broadcast %1 : vector<16x1xi32> to vector<16x32xi32>
    %4 = arith.cmpi eq, %2, %3 : vector<16x32xi32>
    %5 = arith.extui %4 : vector<16x32xi1> to vector<16x32xi32>
    %6 = arith.sitofp %5 : vector<16x32xi32> to vector<16x32xf32>
    %cst = arith.constant dense<0.000000e+00> : vector<16x128xf32>
    %7 = tpu.matmul %6, %0, %cst {dimension_numbers = #tpu.dot_dimension_numbers<[1], [0], [0], [1], [0, 0, 1, 1], [], []>} : vector<16x32xf32>, vector<32x128xf32>, vector<16x128xf32> -> vector<16x128xf32>
    %cst_3 = arith.constant 11.3137083 : f32
    %8 = vector.broadcast %cst_3 : f32 to vector<16x128xf32>
    %9 = arith.mulf %7, %8 : vector<16x128xf32>
    %c0_4 = arith.constant 0 : index
    %c0_5 = arith.constant 0 : index
    %10 = vector.load %arg3[%c0_4, %c0_5] : memref<16x128xf32, #tpu.memory_space<vmem>>, vector<16x128xf32>
    tpu.vector_store %arg3[%c0_4, %c0_5], %9 {strides = array<i32>} : memref<16x128xf32, #tpu.memory_space<vmem>>, vector<16x128xf32>,
    return
  }
  func.func @transform_0(%arg0: i32) -> (i32, i32) {
    %c0_i32 = arith.constant 0 : i32
    %c0_i32_0 = arith.constant 0 : i32
    return %arg0, %c0_i32 : i32, i32
  }
  func.func @transform_1(%arg0: i32) -> (i32, i32) {
    %c0_i32 = arith.constant 0 : i32
    %c0_i32_0 = arith.constant 0 : i32
    %c0_i32_1 = arith.constant 0 : i32
    return %c0_i32, %c0_i32_0 : i32, i32
  }
  func.func @transform_2(%arg0: i32) -> (i32, i32) {
    %c0_i32 = arith.constant 0 : i32
    %c0_i32_0 = arith.constant 0 : i32
    return %arg0, %c0_i32 : i32, i32
  }
}

</mosaic_0001>

<bundles_post_ra>
// kernel: tpu_custom_call.1
= control target key start
LH: loop header
LB: loop body
LE: loop exit
PB: predicated region body
PF: predicated region fallthrough
CT: control target
= control target key end

     0   :  { %7 = vsyncpa [#allocation3], 0  ;;  %s207_s0 = inlined_call_operand.vmem [shape: s32[16,1], index: 0, kind: input, shape index: {}]   ;;  %s208_s1 = inlined_call_operand.hbm [shape: f32[32,128], index: 1, kind: input, shape index: {}]   ;;  %s209_s2 = inlined_call_operand.hbm [shape: f32[16,128], index: 2, kind: output, shape index: {}]  }
   0x1   :  { %8 = vsyncpa [#allocation4], 0  ;;  %s15_s11 = sshll.u32 %s208_s1, 4  ;;  %s168_s12 = smov [#allocation2]   ;;  %s16_s11 = int_to_ptr.hbm [resolvable:$true] %s15_s11 }
   0x2   :  { %s17_s13 = sshll.u32 %s168_s12, 4  ;;  %s169_s14 = smov 128   ;;  %s18_s13 = int_to_ptr.vmem [resolvable:$true] %s17_s13 }
   0x3   :  { %s170_s15 = smov 8  }
   0x4   :  { %23 = dma.hbm_to_vmem [thread:$0]  %s16_s11, 512, %s18_s13, [#allocation3], %s169_s14, %s169_s14, %s170_s15  }
   0x5   :  { %164 = dma.done.wait [#allocation3], 512  }
   0x6   :  { %165 = vsyncadd [#allocation3], 4294966784  ;;  %v171_v0 = vmov 0   ;;  %v32_v1 = vld [vmem:[%s207_s0] sm:$0xff]  ;;  %v31_v2 = vld [vmem:[#allocation2 + $0x18] sm:$0xff]  ;;  %v34_v7 = vlaneseq  ;;  %vm48_vm0 = vcmask 261120  }
   0x7   :  { %115 = vset.pattern.permute.xlu0 %v171_v0  ;;  %67 = vmatpush.msra.mxu0 %v31_v2  ;;  %v30_v3 = vld [vmem:[#allocation2 + $0x10] sm:$0xff]  ;;  %v33_v4 = vld [vmem:[%s207_s0 + $0x8] sm:$0xff]  ;;  %v28_v6 = vld [vmem:[#allocation2] sm:$0xff]  ;;  %v172_v10 = vmov 0.0   ;;  %s173_s0 = smov [#allocation5]   ;;  %s88_s22 = sshll.u32 %s209_s2, 4  ;;  %s89_s22 = int_to_ptr.hbm [resolvable:$true] %s88_s22 }
   0x8   :  { %37 = vperm.xlu0 %115, %v32_v1   ;;  %105 = vmatpush.msra.mxu1 %v31_v2  ;;  %v29_v5 = vld [vmem:[#allocation2 + $0x8] sm:$0xff]  ;;  %v35_v8 = vand.u32 127, %v34_v7  ;;  %s86_s19 = sshll.u32 %s173_s0, 4  ;;  %s87_s19 = int_to_ptr.vmem [resolvable:$true] %s86_s19 }
   0x9   :  { %68 = vmatpush.msra.mxu0 %v30_v3 }
   0xa   :  { %106 = vmatpush.msra.mxu1 %v30_v3 }
   0xb   :  { %69 = vmatpush.msra.mxu0 %v29_v5 }
   0xc   :  { %107 = vmatpush.msra.mxu1 %v29_v5 }
   0xd   :  { %70 = vmatpush.msra.mxu0 %v28_v6 }
   0xe   :  { %108 = vmatpush.msra.mxu1 %v28_v6 }
  0x10   :  { %40 = vperm.xlu0 %115, %v33_v4  }
  0x7a   :  { %v38_v9 = vpop.permute.xlu0 %37 }
  0x7b   :  { %vm42_vm1 = vcmp.eq.s32.totalorder %v35_v8, %v38_v9 }
  0x7c   :  { %v101_v11 = vsel %vm42_vm1, 1.0, %v172_v10 }
  0x7d   :  { %103 = vmatmul.msk.f32.vlgmr.msra.gmra.mxu0 %vm48_vm0, %v101_v11 }
  0x82   :  { %v41_v12 = vpop.permute.xlu0 %40 }
  0x83   :  { %vm43_vm2 = vcmp.eq.s32.totalorder %v35_v8, %v41_v12 }
  0x84   :  { %v102_v13 = vsel %vm43_vm2, 1.0, %v172_v10 }
  0x85   :  { %104 = vmatmul.msk.f32.vlgmr.msra.gmra.mxu1 %vm48_vm0, %v102_v13 }
  0xfa   :  { %v72_v14 = vpop.f32.mrf.mxu0 }
  0xfb   :  { %v78_v15 = vmul.f32 11.313708, %v72_v14 }
  0xfd   :  { %80 = vst [vmem:[#allocation5] sm:$0xff] %v78_v15 }
 0x102   :  { %v75_v16 = vpop.f32.mrf.mxu1 }
 0x103   :  { %v79_v17 = vmul.f32 11.313708, %v75_v16 }
 0x105   :  { %81 = vst [vmem:[#allocation5 + $0x8] sm:$0xff] %v79_v17 }
 0x106   :  { %94 = dma.vmem_to_hbm [thread:$0]  %s87_s19, 256, %s89_s22, [#allocation4], %s169_s14, %s169_s14, %s170_s15  }
 0x107   :  { %166 = dma.done.wait [#allocation4], 256  }
 0x108   :  { %167 = vsyncadd [#allocation4], 4294967040 }
 0x109   :  { %99 = vsyncpa [#allocation3], 1 }
 0x10a   :  { %100 = vsyncpa [#allocation4], 1 }

</bundles_post_ra>
